<compile_context>
chip_gen: v7x
topology: tpu7x:2x2x1
jax: 0.10.0
libtpu: 0.0.40
codegen_flags: <defaults>
</compile_context>

<pallas_src>
import math
import jax
import jax.numpy as jnp
from jax.experimental import pallas as pl
from jax.experimental.pallas import tpu as pltpu


# ----------------------------- schedule buffers -----------------------------

def cosine_beta_schedule(timesteps, s=0.008):
    steps = timesteps + 1
    x = jnp.linspace(0.0, timesteps, steps, dtype=jnp.float32)
    alphas_cumprod = jnp.cos((x / timesteps + s) / (1 + s) * math.pi * 0.5) ** 2
    alphas_cumprod = alphas_cumprod / alphas_cumprod[0]
    betas = 1.0 - alphas_cumprod[1:] / alphas_cumprod[:-1]
    return jnp.clip(betas, 0.0, 0.999)


def make_buffers(timesteps):
    betas = cosine_beta_schedule(timesteps)
    alphas = 1.0 - betas
    alphas_cumprod = jnp.cumprod(alphas, axis=0)
    return dict(
        sqrt_alphas_cumprod=jnp.sqrt(alphas_cumprod).astype(jnp.float32),
        sqrt_one_minus_alphas_cumprod=jnp.sqrt(1.0 - alphas_cumprod).astype(jnp.float32),
        # objective == 'pred_noise' => loss_weight = ones(T); kept for reference
        loss_weight=jnp.ones_like(alphas_cumprod, dtype=jnp.float32),
    )


# -------------------------------- the kernel --------------------------------

def diffusion_loss_kernel(x0_ref,      # VMEM (TB, L, D) f32
                          noise_ref,   # VMEM (TB, L, D) f32
                          sa_ref,      # VMEM (TB, L, 1) f32  sqrt(alphas_cumprod[t])
                          soma_ref,    # VMEM (TB, L, 1) f32  sqrt(1 - alphas_cumprod[t])
                          bias_ref,    # VMEM (TB, 1, H) f32  b1 + time_emb[t]
                          w1_ref,      # VMEM (D, H) bf16 (resident)
                          w2_ref,      # VMEM (H, D) bf16 (resident)
                          b2_ref,      # VMEM (1, D) f32  (resident)
                          psum_ref):   # VMEM (1, 1, D) f32  per-block partial sum
    TB, L, D = x0_ref.shape
    H = w1_ref.shape[1]

    x0 = x0_ref[...]
    noise = noise_ref[...]

    # q_sample (VPU, f32): x_t = sqrt_ac[t] * x0 + sqrt_1m_ac[t] * noise
    x_t = sa_ref[...] * x0 + soma_ref[...] * noise                 # (TB, L, D)

    # Synthetic denoiser: time-conditioned 2-layer MLP.  Fold the batch into
    # the MXU M dimension; (TB, 8, 128) -> (TB*8, 128) is tile-aligned (free).
    x2d = x_t.reshape(TB * L, D).astype(jnp.bfloat16)
    h = jnp.dot(x2d, w1_ref[...], preferred_element_type=jnp.float32)   # (TB*L, H)
    h = h.reshape(TB, L, H) + bias_ref[...]                             # + (b1 + t_emb)
    h = jnp.maximum(h, 0.0)
    h2d = h.reshape(TB * L, H).astype(jnp.bfloat16)
    out = jnp.dot(h2d, w2_ref[...], preferred_element_type=jnp.float32)  # (TB*L, D)
    out = out + b2_ref[...]

    # MSE vs noise.  loss_weight[t] == 1 for pred_noise, so no weight multiply.
    diff = out - noise.reshape(TB * L, D)
    # Reduce over rows only (cheap VALU adds + one sublane reduce); the lane
    # axis of the tiny (num_blocks, D) partials array is reduced in JAX.
    psum_ref[0] = jnp.sum(diff * diff, axis=0, keepdims=True)            # (1, D)


def _choose_batch_tile(B, L, D, target_rows=1024, stream_budget_bytes=8 * 1024 * 1024):
    """Largest divisor of B such that TB*L rows feed the MXU well while the
    double-buffered x0/noise streams stay within a conservative VMEM budget."""
    tb_rows = max(1, target_rows // max(L, 1))
    bytes_per_batch_elem = 2 * 2 * L * D * 4          # x0 + noise, 2 buffers, f32
    tb_vmem = max(1, stream_budget_bytes // bytes_per_batch_elem)
    tb_max = int(min(B, tb_rows, tb_vmem))
    tb = 1
    for d in range(1, tb_max + 1):
        if B % d == 0:
            tb = d
    return tb


@jax.jit
def pallas_diffusion_loss(x0_emb, noise, sa, soma, bias, w1, w2, b2):
    B, L, D = x0_emb.shape
    H = w1.shape[1]
    TB = _choose_batch_tile(B, L, D)
    num_blocks = B // TB

    grid_spec = pltpu.PrefetchScalarGridSpec(
        num_scalar_prefetch=0,
        grid=(num_blocks,),
        in_specs=[
            pl.BlockSpec((TB, L, D), lambda i: (i, 0, 0)),   # x0_emb
            pl.BlockSpec((TB, L, D), lambda i: (i, 0, 0)),   # noise
            pl.BlockSpec((TB, L, 1), lambda i: (i, 0, 0)),   # sqrt_ac[t]
            pl.BlockSpec((TB, L, 1), lambda i: (i, 0, 0)),   # sqrt_1m_ac[t]
            pl.BlockSpec((TB, 1, H), lambda i: (i, 0, 0)),   # b1 + time_emb[t]
            pl.BlockSpec((D, H), lambda i: (0, 0)),          # w1 (resident, bf16)
            pl.BlockSpec((H, D), lambda i: (0, 0)),          # w2 (resident, bf16)
            pl.BlockSpec((1, D), lambda i: (0, 0)),          # b2 (resident, f32)
        ],
        out_specs=pl.BlockSpec((1, 1, D), lambda i: (i, 0, 0)),
    )

    # Advisory cost: 2 matmuls of (B*L, D)x(D, H) and (B*L, H)x(H, D).
    flops = 4 * B * L * D * H
    bytes_accessed = (4 * (2 * B * L * D + 2 * B * L + B * H)   # streamed inputs
                      + 2 * (D * H + H * D) + 4 * D             # resident weights
                      + 4 * num_blocks * D)                     # partial-sum output

    # VMEM: double-buffered streams + resident weights + compute temporaries.
    stream_bytes = 4 * (2 * TB * L * D + 2 * TB * L + TB * H)
    weight_bytes = 2 * (D * H + H * D) + 4 * D
    vmem_limit = int(min(48 * 1024 * 1024,
                         max(16 * 1024 * 1024,
                             4 * stream_bytes + 2 * weight_bytes + (2 << 20))))

    psums = pl.pallas_call(
        diffusion_loss_kernel,
        grid_spec=grid_spec,
        out_shape=jax.ShapeDtypeStruct((num_blocks, 1, D), jnp.float32),
        compiler_params=pltpu.CompilerParams(
            dimension_semantics=("parallel",),          # no carried state
            vmem_limit_bytes=vmem_limit),
        cost_estimate=pl.CostEstimate(flops=flops, transcendentals=0,
                                      bytes_accessed=bytes_accessed),
    )(x0_emb, noise, sa, soma, bias, w1, w2, b2)

    # loss = (1/B) * sum_b mean_{L,D}(diff^2)  (loss_weight == 1)
    return jnp.sum(psums) / (B * L * D)


# ------------------------------- module wrapper ------------------------------

class GaussianDiffusion2DPallas:
    """Deterministic re-implementation of GaussianDiffusion2D.forward."""

    def __init__(self, *, seq_length=8, timesteps=50, vocab_size=64,
                 gaussian_dim=128, hidden_dim=128, seed=0):
        self.seq_length = seq_length
        self.num_timesteps = timesteps
        self.codebook_size = vocab_size
        self.gaussian_dim = gaussian_dim
        self.hidden_dim = hidden_dim
        self.self_condition = False

        bufs = make_buffers(timesteps)
        self.sqrt_alphas_cumprod = bufs["sqrt_alphas_cumprod"]
        self.sqrt_one_minus_alphas_cumprod = bufs["sqrt_one_minus_alphas_cumprod"]
        self.loss_weight = bufs["loss_weight"]

        k = jax.random.PRNGKey(seed)
        k_lut, k_w1, k_w2, k_temb = jax.random.split(k, 4)
        # register_buffer('gaussian_lookup_table', torch.rand(V, gaussian_dim))
        self.gaussian_lookup_table = jax.random.uniform(
            k_lut, (vocab_size, gaussian_dim), dtype=jnp.float32)

        # TODO(synk): the real denoiser `self.model` is an external nn.Module;
        # it is represented here by a synthetic time-conditioned 2-layer MLP.
        # Weights pre-cast to bf16 once (MXU-native on v5e/v6e/v7x).
        self.w1 = ((jax.random.normal(k_w1, (gaussian_dim, hidden_dim), jnp.float32)
                    * (1.0 / math.sqrt(gaussian_dim))).astype(jnp.bfloat16))
        self.b1 = jnp.zeros((1, hidden_dim), jnp.float32)
        self.w2 = ((jax.random.normal(k_w2, (hidden_dim, gaussian_dim), jnp.float32)
                    * (1.0 / math.sqrt(hidden_dim))).astype(jnp.bfloat16))
        self.b2 = jnp.zeros((1, gaussian_dim), jnp.float32)
        self.time_emb = (jax.random.normal(k_temb, (timesteps, hidden_dim), jnp.float32)
                         * 0.02)

    # shared glue: sampling of t / noise, embedding gather, extract() of buffers
    def _prepare(self, x0_indices, key):
        B, L = x0_indices.shape
        k_t, k_noise = jax.random.split(key)
        t = jax.random.randint(k_t, (B,), 0, self.num_timesteps, dtype=jnp.int32)
        x0_emb = self.gaussian_lookup_table[x0_indices]                  # (B, L, D)
        noise = jax.random.normal(k_noise, x0_emb.shape, jnp.float32)
        # extract() of the schedule buffers at t, as per-row VMEM vectors
        sa = jnp.tile(self.sqrt_alphas_cumprod[t][:, None, None], (1, L, 1))
        soma = jnp.tile(self.sqrt_one_minus_alphas_cumprod[t][:, None, None], (1, L, 1))
        # fuse b1 + time embedding into one per-batch bias stream
        bias = (self.b1 + self.time_emb[t])[:, None, :]                  # (B, 1, H)
        # loss_weight[t] == 1 for objective='pred_noise' -> omitted downstream
        # TODO(synk): self-conditioning branch (random() < 0.5) not implemented
        # because self_condition=False for this synthetic model.
        return x0_emb, noise, sa, soma, bias

    def forward(self, x0_indices, key):
        x0_emb, noise, sa, soma, bias = self._prepare(x0_indices, key)
        loss = pallas_diffusion_loss(x0_emb, noise, sa, soma, bias,
                                     self.w1, self.w2, self.b2)
        return {"loss": loss}

    # pure-JAX reference with the same bf16-matmul numerics as the kernel
    def forward_reference(self, x0_indices, key):
        x0_emb, noise, sa, soma, bias = self._prepare(x0_indices, key)
        x_t = sa * x0_emb + soma * noise
        h = jnp.einsum("bld,dh->blh", x_t.astype(jnp.bfloat16), self.w1,
                       preferred_element_type=jnp.float32)
        h = jnp.maximum(h + bias, 0.0)
        out = jnp.einsum("blh,hd->bld", h.astype(jnp.bfloat16), self.w2,
                         preferred_element_type=jnp.float32) + self.b2
        per_b = jnp.mean((out - noise) ** 2, axis=(1, 2))     # loss_weight == 1
        return {"loss": jnp.mean(per_b)}

    # full-f32 reference (same weight values, upcast) for a loose sanity bound
    def forward_reference_f32(self, x0_indices, key):
        x0_emb, noise, sa, soma, bias = self._prepare(x0_indices, key)
        x_t = sa * x0_emb + soma * noise
        h = jnp.maximum(
            jnp.einsum("bld,dh->blh", x_t, self.w1.astype(jnp.float32)) + bias, 0.0)
        out = jnp.einsum("blh,hd->bld", h, self.w2.astype(jnp.float32)) + self.b2
        per_b = jnp.mean((out - noise) ** 2, axis=(1, 2))
        return {"loss": jnp.mean(per_b)}


# ------------------------------------ main -----------------------------------

if __name__ == "__main__":
    T, V, D, H, L = 50, 64, 128, 128, 8
    module = GaussianDiffusion2DPallas(seq_length=L, timesteps=T, vocab_size=V,
                                       gaussian_dim=D, hidden_dim=H, seed=0)

    root = jax.random.PRNGKey(0)
    k_idx, k_fwd, k_idx2, k_fwd2 = jax.random.split(root, 4)

    # small smoke test (B=2): single grid block
    x0_small = jax.random.randint(k_idx, (2, L), 0, V, dtype=jnp.int32)
    loss_small = jax.block_until_ready(module.forward(x0_small, k_fwd)["loss"])
    ref_small = module.forward_reference(x0_small, k_fwd)["loss"]
    ref_small_f32 = module.forward_reference_f32(x0_small, k_fwd)["loss"]
    assert jnp.allclose(loss_small, ref_small, rtol=1e-3, atol=1e-6), (loss_small, ref_small)
    assert jnp.allclose(loss_small, ref_small_f32, rtol=5e-2, atol=1e-3), (loss_small, ref_small_f32)

    # larger batch exercising the batched-MXU, multi-block "parallel" path
    x0_big = jax.random.randint(k_idx2, (160, L), 0, V, dtype=jnp.int32)
    loss_big = jax.block_until_ready(module.forward(x0_big, k_fwd2)["loss"])
    ref_big = module.forward_reference(x0_big, k_fwd2)["loss"]
    assert jnp.allclose(loss_big, ref_big, rtol=1e-3, atol=1e-6), (loss_big, ref_big)

    print("KERNEL_OK")
</pallas_src>

<mosaic_0001>
module attributes {stable_mosaic.version = 11 : i64} {
  func.func @diffusion_loss_kernel(%arg0: i32, %arg1: memref<2x8x128xf32, #tpu.memory_space<vmem>>, %arg2: memref<2x8x128xf32, #tpu.memory_space<vmem>>, %arg3: memref<2x8x1xf32, #tpu.memory_space<vmem>>, %arg4: memref<2x8x1xf32, #tpu.memory_space<vmem>>, %arg5: memref<2x1x128xf32, #tpu.memory_space<vmem>>, %arg6: memref<128x128xbf16, #tpu.memory_space<vmem>>, %arg7: memref<128x128xbf16, #tpu.memory_space<vmem>>, %arg8: memref<1x128xf32, #tpu.memory_space<vmem>>, %arg9: memref<1x1x128xf32, #tpu.memory_space<vmem>>) attributes {dimension_semantics = [#tpu.dimension_semantics<parallel>], iteration_bounds = array<i64: 1>, scalar_prefetch = 0 : i64, scratch_operands = 0 : i64, tpu.core_type = #tpu.core_type<tc>, window_params = [{transform_indices = @transform_0, window_bounds = array<i64: 2, 8, 128>}, {transform_indices = @transform_1, window_bounds = array<i64: 2, 8, 128>}, {transform_indices = @transform_2, window_bounds = array<i64: 2, 8, 1>}, {transform_indices = @transform_3, window_bounds = array<i64: 2, 8, 1>}, {transform_indices = @transform_4, window_bounds = array<i64: 2, 1, 128>}, {pipeline_mode = #tpu.pipeline_mode<synchronous>, transform_indices = @transform_5, window_bounds = array<i64: 128, 128>}, {pipeline_mode = #tpu.pipeline_mode<synchronous>, transform_indices = @transform_6, window_bounds = array<i64: 128, 128>}, {pipeline_mode = #tpu.pipeline_mode<synchronous>, transform_indices = @transform_7, window_bounds = array<i64: 1, 128>}, {transform_indices = @transform_8, window_bounds = array<i64: 1, 1, 128>}]} {
    %c0 = arith.constant 0 : index
    %c0_0 = arith.constant 0 : index
    %c0_1 = arith.constant 0 : index
    %0 = vector.load %arg1[%c0, %c0_0, %c0_1] : memref<2x8x128xf32, #tpu.memory_space<vmem>>, vector<2x8x128xf32>
    %c0_2 = arith.constant 0 : index
    %c0_3 = arith.constant 0 : index
    %c0_4 = arith.constant 0 : index
    %1 = vector.load %arg2[%c0_2, %c0_3, %c0_4] : memref<2x8x128xf32, #tpu.memory_space<vmem>>, vector<2x8x128xf32>
    %c0_5 = arith.constant 0 : index
    %c0_6 = arith.constant 0 : index
    %c0_7 = arith.constant 0 : index
    %2 = vector.load %arg3[%c0_5, %c0_6, %c0_7] : memref<2x8x1xf32, #tpu.memory_space<vmem>>, vector<2x8x1xf32>
    %3 = vector.broadcast %2 : vector<2x8x1xf32> to vector<2x8x128xf32>
    %4 = arith.mulf %3, %0 : vector<2x8x128xf32>
    %c0_8 = arith.constant 0 : index
    %c0_9 = arith.constant 0 : index
    %c0_10 = arith.constant 0 : index
    %5 = vector.load %arg4[%c0_8, %c0_9, %c0_10] : memref<2x8x1xf32, #tpu.memory_space<vmem>>, vector<2x8x1xf32>
    %6 = vector.broadcast %5 : vector<2x8x1xf32> to vector<2x8x128xf32>
    %7 = arith.mulf %6, %1 : vector<2x8x128xf32>
    %8 = arith.addf %4, %7 : vector<2x8x128xf32>
    %9 = vector.shape_cast %8 : vector<2x8x128xf32> to vector<16x128xf32>
    %10 = arith.truncf %9 : vector<16x128xf32> to vector<16x128xbf16>
    %c0_11 = arith.constant 0 : index
    %c0_12 = arith.constant 0 : index
    %11 = vector.load %arg6[%c0_11, %c0_12] : memref<128x128xbf16, #tpu.memory_space<vmem>>, vector<128x128xbf16>
    %cst = arith.constant dense<0.000000e+00> : vector<16x128xf32>
    %12 = tpu.matmul %10, %11, %cst {dimension_numbers = #tpu.dot_dimension_numbers<[1], [0], [0], [1], [0, 0, 1, 1], [], []>} : vector<16x128xbf16>, vector<128x128xbf16>, vector<16x128xf32> -> vector<16x128xf32>
    %13 = vector.shape_cast %12 : vector<16x128xf32> to vector<2x8x128xf32>
    %c0_13 = arith.constant 0 : index
    %c0_14 = arith.constant 0 : index
    %c0_15 = arith.constant 0 : index
    %14 = vector.load %arg5[%c0_13, %c0_14, %c0_15] : memref<2x1x128xf32, #tpu.memory_space<vmem>>, vector<2x1x128xf32>
    %15 = vector.broadcast %14 : vector<2x1x128xf32> to vector<2x8x128xf32>
    %16 = arith.addf %13, %15 : vector<2x8x128xf32>
    %cst_16 = arith.constant 0.000000e+00 : f32
    %17 = vector.broadcast %cst_16 : f32 to vector<2x8x128xf32>
    %18 = arith.maximumf %16, %17 : vector<2x8x128xf32>
    %19 = vector.shape_cast %18 : vector<2x8x128xf32> to vector<16x128xf32>
    %20 = arith.truncf %19 : vector<16x128xf32> to vector<16x128xbf16>
    %c0_17 = arith.constant 0 : index
    %c0_18 = arith.constant 0 : index
    %21 = vector.load %arg7[%c0_17, %c0_18] : memref<128x128xbf16, #tpu.memory_space<vmem>>, vector<128x128xbf16>
    %cst_19 = arith.constant dense<0.000000e+00> : vector<16x128xf32>
    %22 = tpu.matmul %20, %21, %cst_19 {dimension_numbers = #tpu.dot_dimension_numbers<[1], [0], [0], [1], [0, 0, 1, 1], [], []>} : vector<16x128xbf16>, vector<128x128xbf16>, vector<16x128xf32> -> vector<16x128xf32>
    %c0_20 = arith.constant 0 : index
    %c0_21 = arith.constant 0 : index
    %23 = vector.load %arg8[%c0_20, %c0_21] : memref<1x128xf32, #tpu.memory_space<vmem>>, vector<1x128xf32>
    %24 = vector.broadcast %23 : vector<1x128xf32> to vector<16x128xf32>
    %25 = arith.addf %22, %24 : vector<16x128xf32>
    %26 = vector.shape_cast %1 : vector<2x8x128xf32> to vector<16x128xf32>
    %27 = arith.subf %25, %26 : vector<16x128xf32>
    %28 = arith.mulf %27, %27 : vector<16x128xf32>
    %cst_22 = arith.constant dense<0.000000e+00> : vector<128xf32>
    %29 = vector.multi_reduction <add>, %28, %cst_22 [0] : vector<16x128xf32> to vector<128xf32>
    %30 = vector.shape_cast %29 : vector<128xf32> to vector<1x128xf32>
    %c0_23 = arith.constant 0 : index
    %c0_24 = arith.constant 0 : index
    %c0_25 = arith.constant 0 : index
    %31 = vector.load %arg9[%c0_23, %c0_24, %c0_25] : memref<1x1x128xf32, #tpu.memory_space<vmem>>, vector<1x1x128xf32>
    %32 = vector.shape_cast %31 : vector<1x1x128xf32> to vector<1x128xf32>
    %33 = vector.shape_cast %30 : vector<1x128xf32> to vector<1x1x128xf32>
    tpu.vector_store %arg9[%c0_23, %c0_24, %c0_25], %33 {strides = array<i32>} : memref<1x1x128xf32, #tpu.memory_space<vmem>>, vector<1x1x128xf32>,
    return
  }
  func.func @transform_0(%arg0: i32) -> (i32, i32, i32) {
    %c0_i32 = arith.constant 0 : i32
    %c0_i32_0 = arith.constant 0 : i32
    %c0_i32_1 = arith.constant 0 : i32
    return %arg0, %c0_i32, %c0_i32_0 : i32, i32, i32
  }
  func.func @transform_1(%arg0: i32) -> (i32, i32, i32) {
    %c0_i32 = arith.constant 0 : i32
    %c0_i32_0 = arith.constant 0 : i32
    %c0_i32_1 = arith.constant 0 : i32
    return %arg0, %c0_i32, %c0_i32_0 : i32, i32, i32
  }
  func.func @transform_2(%arg0: i32) -> (i32, i32, i32) {
    %c0_i32 = arith.constant 0 : i32
    %c0_i32_0 = arith.constant 0 : i32
    %c0_i32_1 = arith.constant 0 : i32
    return %arg0, %c0_i32, %c0_i32_0 : i32, i32, i32
  }
  func.func @transform_3(%arg0: i32) -> (i32, i32, i32) {
    %c0_i32 = arith.constant 0 : i32
    %c0_i32_0 = arith.constant 0 : i32
    %c0_i32_1 = arith.constant 0 : i32
    return %arg0, %c0_i32, %c0_i32_0 : i32, i32, i32
  }
  func.func @transform_4(%arg0: i32) -> (i32, i32, i32) {
    %c0_i32 = arith.constant 0 : i32
    %c0_i32_0 = arith.constant 0 : i32
    %c0_i32_1 = arith.constant 0 : i32
    return %arg0, %c0_i32, %c0_i32_0 : i32, i32, i32
  }
  func.func @transform_5(%arg0: i32) -> (i32, i32) {
    %c0_i32 = arith.constant 0 : i32
    %c0_i32_0 = arith.constant 0 : i32
    %c0_i32_1 = arith.constant 0 : i32
    return %c0_i32, %c0_i32_0 : i32, i32
  }
  func.func @transform_6(%arg0: i32) -> (i32, i32) {
    %c0_i32 = arith.constant 0 : i32
    %c0_i32_0 = arith.constant 0 : i32
    %c0_i32_1 = arith.constant 0 : i32
    return %c0_i32, %c0_i32_0 : i32, i32
  }
  func.func @transform_7(%arg0: i32) -> (i32, i32) {
    %c0_i32 = arith.constant 0 : i32
    %c0_i32_0 = arith.constant 0 : i32
    %c0_i32_1 = arith.constant 0 : i32
    return %c0_i32, %c0_i32_0 : i32, i32
  }
  func.func @transform_8(%arg0: i32) -> (i32, i32, i32) {
    %c0_i32 = arith.constant 0 : i32
    %c0_i32_0 = arith.constant 0 : i32
    %c0_i32_1 = arith.constant 0 : i32
    return %arg0, %c0_i32, %c0_i32_0 : i32, i32, i32
  }
}

</mosaic_0001>

<bundles_post_ra>
// kernel: pallas_diffusion_loss.1
= control target key start
LH: loop header
LB: loop body
LE: loop exit
PB: predicated region body
PF: predicated region fallthrough
CT: control target
= control target key end

     0   :  { %13 = vsyncpa [#allocation3], 0  ;;  %s627_s0 = inlined_call_operand.vmem [shape: f32[2,8,128], index: 0, kind: input, shape index: {}]   ;;  %s628_s1 = inlined_call_operand.vmem [shape: f32[2,8,128], index: 1, kind: input, shape index: {}]   ;;  %s629_s2 = inlined_call_operand.vmem [shape: f32[2,8,1], index: 2, kind: input, shape index: {}]   ;;  %s630_s3 = inlined_call_operand.vmem [shape: f32[2,8,1], index: 3, kind: input, shape index: {}]   ;;  %s631_s4 = inlined_call_operand.vmem [shape: f32[2,1,128], index: 4, kind: input, shape index: {}]   ;;  %s632_s5 = inlined_call_operand.hbm [shape: bf16[128,128], index: 5, kind: input, shape index: {}]   ;;  %s633_s6 = inlined_call_operand.hbm [shape: bf16[128,128], index: 6, kind: input, shape index: {}]   ;;  %s634_s7 = inlined_call_operand.vmem [shape: f32[1,128], index: 7, kind: input, shape index: {}]   ;;  %s635_s8 = inlined_call_operand.vmem [shape: f32[1,1,128], index: 8, kind: output, shape index: {}]  }
   0x1   :  { %14 = vsyncpa [#allocation5], 0  ;;  %s497_s27 = smov [#allocation2]   ;;  %s449_s9 = scalar_lea.hbm %s632_s5, 1024 }
   0x2   :  { %s30_s28 = sshll.u32 %s497_s27, 4  ;;  %p450_p0 = scmp.ne.s32.totalorder %s632_s5, %s449_s9  ;;  %s31_s28 = int_to_ptr.vmem [resolvable:$true] %s30_s28 }
   0x3   :  { %p453_p1 = scmp.lt.u32.totalorder %s449_s9, %s632_s5 }
   0x5   :  { %p455_p2 = pnand %p453_p1, %p450_p0 }
   0x7   :  { %458 = shalt.err (!%p455_p2)
}
   0x8   :  { %s459_s14 = scalar_lea.vmem %s31_s28, 1024  ;;  %p464_p4 = scmp.lt.s32.totalorder %s31_s28, %s31_s28 }
   0x9   :  { %p460_p3 = scmp.ne.s32.totalorder %s31_s28, %s459_s14  ;;  %p465_p5 = scmp.lt.s32.totalorder %s459_s14, %s459_s14 }
   0xb   :  { %p466_p6 = por %p465_p5, %p464_p4 }
   0xd   :  { %p467_p7 = pnand %p466_p6, %p460_p3 }
   0xf   :  { %470 = shalt.err (!%p467_p7)
}
  0x10   :  { %s498_s15 = smov 64   ;;  %s499_s16 = smov 4  }
  0x11   :  { %36 = dma.hbm_to_vmem [thread:$0]  %s632_s5, 1024, %s31_s28, [#allocation3], %s498_s15, %s498_s15, %s499_s16  }
  0x12   :  { %s500_s19 = smov [#allocation4]   ;;  %s471_s23 = scalar_lea.hbm %s633_s6, 1024 }
  0x13   :  { %s42_s20 = sshll.u32 %s500_s19, 4  ;;  %p472_p8 = scmp.ne.s32.totalorder %s633_s6, %s471_s23  ;;  %s43_s20 = int_to_ptr.vmem [resolvable:$true] %s42_s20 }
  0x14   :  { %p475_p9 = scmp.lt.u32.totalorder %s471_s23, %s633_s6 }
  0x16   :  { %p477_p10 = pnand %p475_p9, %p472_p8 }
  0x18   :  { %480 = shalt.err (!%p477_p10)
}
  0x19   :  { %s481_s29 = scalar_lea.vmem %s43_s20, 1024  ;;  %p486_p12 = scmp.lt.s32.totalorder %s43_s20, %s43_s20 }
  0x1a   :  { %p482_p11 = scmp.ne.s32.totalorder %s43_s20, %s481_s29  ;;  %p487_p13 = scmp.lt.s32.totalorder %s481_s29, %s481_s29 }
  0x1c   :  { %p488_p0 = por %p487_p13, %p486_p12 }
  0x1e   :  { %p489_p1 = pnand %p488_p0, %p482_p11 }
  0x20   :  { %492 = shalt.err (!%p489_p1)
}
  0x21   :  { %48 = dma.hbm_to_vmem [thread:$0]  %s633_s6, 1024, %s43_s20, [#allocation5], %s498_s15, %s498_s15, %s499_s16  }
  0x22   :  { %493 = dma.done.wait [#allocation3], 1024  }
  0x23   :  { %494 = vsyncadd [#allocation3], 4294966272 }
  0x24   :  { %495 = dma.done.wait [#allocation5], 1024  }
  0x25   :  { %496 = vsyncadd [#allocation5], 4294966272  ;;  %v501_v0 = vmov 0   ;;  %v502_v1 = vmov 0.0   ;;  %v76_v2 = vld [vmem:[%s630_s3] sm:$0xff]  ;;  %v77_v4 = vld [vmem:[%s630_s3 + $0x8] sm:$0xff] }
  0x26   :  { %432 = vset.pattern.permute.xlu1 %v501_v0  ;;  %431 = vset.pattern.permute.xlu0 %v501_v0  ;;  %v62_v3 = vld [vmem:[%s629_s2] sm:$0xff]  ;;  %v63_v5 = vld [vmem:[%s629_s2 + $0x8] sm:$0xff]  ;;  %v435_v8 = vld [vmem:[#allocation2 + $0x10] sm:$0xff]   ;;  %vm503_vm0 = vmmov 0  }
  0x27   :  { %384 = vmatprep.subr.bf16.mxu0 %v502_v1  ;;  %404 = vmatprep.subr.bf16.mxu1 %v502_v1  ;;  %v433_v6 = vld [vmem:[#allocation2] sm:$0xff]   ;;  %v434_v7 = vld [vmem:[#allocation2 + $0x8] sm:$0xff]   ;;  %v436_v10 = vld [vmem:[#allocation2 + $0x18] sm:$0xff]  }
  0x28   :  { %80 = vperm.xlu1 %432, %v76_v2   ;;  %66 = vperm.xlu0 %431, %v62_v3   ;;  %v441_v9 = vld [vmem:[#allocation4] sm:$0xff]   ;;  %v442_v11 = vld [vmem:[#allocation4 + $0x8] sm:$0xff]   ;;  %v443_v13 = vld [vmem:[#allocation4 + $0x10] sm:$0xff]  }
  0x29   :  { %385 = vmatpush3.bf16.msra.mxu0 %v433_v6  ;;  %400 = vmatprep.mubr.msk.bf16.mxu0 %vm503_vm0, %v502_v1  ;;  %v437_v12 = vld [vmem:[#allocation2 + $0x20] sm:$0xff]   ;;  %v438_v14 = vld [vmem:[#allocation2 + $0x28] sm:$0xff]   ;;  %v444_v15 = vld [vmem:[#allocation4 + $0x18] sm:$0xff]  }
  0x2a   :  { %386 = vmatprep.subr.bf16.mxu0 %v502_v1  ;;  %420 = vmatprep.mubr.msk.bf16.mxu1 %vm503_vm0, %v502_v1  ;;  %v439_v16 = vld [vmem:[#allocation2 + $0x30] sm:$0xff]   ;;  %v445_v17 = vld [vmem:[#allocation4 + $0x20] sm:$0xff]   ;;  %v440_v18 = vld [vmem:[#allocation2 + $0x38] sm:$0xff]  }
  0x2b   :  { %405 = vmatpush3.bf16.msra.mxu1 %v441_v9  ;;  %v446_v19 = vld [vmem:[#allocation4 + $0x28] sm:$0xff]   ;;  %v60_v21 = vld [vmem:[%s628_s1] sm:$0xff]  ;;  %v447_v35 = vld [vmem:[#allocation4 + $0x30] sm:$0xff]  }
  0x2c   :  { %85 = vperm.xlu1 %432, %v77_v4   ;;  %71 = vperm.xlu0 %431, %v63_v5   ;;  %v58_v23 = vld [vmem:[%s627_s0] sm:$0xff]  ;;  %v61_v24 = vld [vmem:[%s628_s1 + $0x8] sm:$0xff]  ;;  %v448_v36 = vld [vmem:[#allocation4 + $0x38] sm:$0xff]  }
  0x2d   :  { %387 = vmatpush3.bf16.msra.mxu0 %v434_v7  ;;  %406 = vmatprep.subr.bf16.mxu1 %v502_v1  ;;  %v59_v25 = vld [vmem:[%s627_s0 + $0x8] sm:$0xff]  ;;  %v355_v37 = vld [vmem:[%s631_s4] ss:$0 sm:$0xff]  ;;  %v356_v39 = vld [vmem:[%s631_s4 + $0x1] ss:$0 sm:$0xff] }
  0x2e   :  { %388 = vmatprep.subr.bf16.mxu0 %v502_v1  ;;  %v357_v48 = vld [vmem:[%s634_s7] ss:$0 sm:$0xff] }
  0x2f   :  { %407 = vmatpush3.bf16.msra.mxu1 %v442_v11 }
  0x30   :  { %408 = vmatprep.subr.bf16.mxu1 %v502_v1 }
  0x31   :  { %389 = vmatpush3.bf16.msra.mxu0 %v435_v8 }
  0x32   :  { %390 = vmatprep.subr.bf16.mxu0 %v502_v1 }
  0x33   :  { %409 = vmatpush3.bf16.msra.mxu1 %v443_v13 }
  0x34   :  { %410 = vmatprep.subr.bf16.mxu1 %v502_v1 }
  0x35   :  { %391 = vmatpush3.bf16.msra.mxu0 %v436_v10 }
  0x36   :  { %392 = vmatprep.subr.bf16.mxu0 %v502_v1 }
  0x37   :  { %411 = vmatpush3.bf16.msra.mxu1 %v444_v15 }
  0x38   :  { %412 = vmatprep.subr.bf16.mxu1 %v502_v1 }
  0x39   :  { %393 = vmatpush3.bf16.msra.mxu0 %v437_v12 }
  0x3a   :  { %394 = vmatprep.subr.bf16.mxu0 %v502_v1 }
  0x3b   :  { %413 = vmatpush3.bf16.msra.mxu1 %v445_v17 }
  0x3c   :  { %414 = vmatprep.subr.bf16.mxu1 %v502_v1 }
  0x3d   :  { %395 = vmatpush3.bf16.msra.mxu0 %v438_v14 }
  0x3e   :  { %396 = vmatprep.subr.bf16.mxu0 %v502_v1 }
  0x3f   :  { %415 = vmatpush3.bf16.msra.mxu1 %v446_v19 }
  0x40   :  { %416 = vmatprep.subr.bf16.mxu1 %v502_v1 }
  0x41   :  { %397 = vmatpush3.bf16.msra.mxu0 %v439_v16 }
  0x42   :  { %398 = vmatprep.subr.bf16.mxu0 %v502_v1 }
  0x43   :  { %417 = vmatpush3.bf16.msra.mxu1 %v447_v35 }
  0x44   :  { %418 = vmatprep.subr.bf16.mxu1 %v502_v1 }
  0x45   :  { %399 = vmatpush3.bf16.msra.mxu0 %v440_v18 }
  0x47   :  { %419 = vmatpush3.bf16.msra.mxu1 %v448_v36 }
  0xa7   :  { %v81_v20 = vpop.permute.xlu1 %80  ;;  %v67_v22 = vpop.permute.xlu0 %66 }
  0xa8   :  { %v88_v26 = vmul.f32 %v81_v20, %v60_v21  ;;  %v74_v27 = vmul.f32 %v67_v22, %v58_v23 }
  0xaa   :  { %v90_v32 = vadd.f32 %v88_v26, %v74_v27 }
  0xab   :  { %v86_v28 = vpop.permute.xlu1 %85  ;;  %v72_v29 = vpop.permute.xlu0 %71 }
  0xac   :  { %v89_v30 = vmul.f32 %v86_v28, %v61_v24  ;;  %v75_v31 = vmul.f32 %v72_v29, %v59_v25 }
  0xae   :  { %v91_v33 = vadd.f32 %v89_v30, %v75_v31 }
  0xb0   :  { %v92_v34 = vpack.c.bf16 %v91_v33, %v90_v32 }
  0xb2   :  { %401 = vmatmul.mubr.bf16.vlgmr.msra.gmra.mrb[0].mxu0 %v92_v34 }
 0x185   :  { %v191_v38 = vpop.f32.mrb[0].mxu0 }
 0x186   :  { %v212_v40 = vadd.f32 %v355_v37, %v191_v38  ;;  %v402_v41 = vpop.f32.mrb[1].mxu0 }
 0x187   :  { %v194_v42 = vpop.f32.mrb[2].mxu0 }
 0x188   :  { %v213_v43 = vadd.f32 %v356_v39, %v194_v42  ;;  %v403_v44 = vpop.f32.mrb[3].mxu0  ;;  %v214_v45 = vmax.f32 %v212_v40, 0.0 }
 0x18a   :  { %v215_v46 = vmax.f32 %v213_v43, 0.0 }
 0x18c   :  { %v216_v47 = vpack.c.bf16 %v215_v46, %v214_v45 }
 0x18e   :  { %421 = vmatmul.mubr.bf16.vlgmr.msra.gmra.mrb[0].mxu1 %v216_v47 }
 0x261   :  { %v322_v49 = vpop.f32.mrb[0].mxu1 }
 0x262   :  { %v323_v50 = vadd.f32 %v357_v48, %v322_v49  ;;  %v422_v51 = vpop.f32.mrb[1].mxu1 }
 0x263   :  { %v325_v52 = vpop.f32.mrb[2].mxu1 }
 0x264   :  { %v329_v53 = vsub.f32 %v323_v50, %v60_v21  ;;  %v326_v54 = vadd.f32 %v357_v48, %v325_v52  ;;  %v423_v55 = vpop.f32.mrb[3].mxu1 }
 0x266   :  { %v330_v56 = vsub.f32 %v326_v54, %v61_v24  ;;  %v331_v57 = vmul.f32 %v329_v53, %v329_v53 }
 0x268   :  { %v332_v58 = vmul.f32 %v330_v56, %v330_v56 }
 0x26a   :  { %v333_v59 = vadd.f32 %v332_v58, %v331_v57 }
 0x26c   :  { %v334_v60 = vrot.slane %v333_v59, 4 }
 0x26e   :  { %v335_v61 = vadd.f32 %v334_v60, %v333_v59 }
 0x270   :  { %v336_v62 = vrot.slane %v335_v61, 2 }
 0x272   :  { %v337_v63 = vadd.f32 %v336_v62, %v335_v61 }
 0x274   :  { %v338_v0 = vrot.slane %v337_v63, 1 }
 0x276   :  { %v339_v1 = vadd.f32 %v338_v0, %v337_v63 }
 0x278   :  { %340 = vst [vmem:[%s635_s8] sm:$0x1] %v339_v1 }
 0x279   :  { %345 = vsyncpa [#allocation3], 1 }
 0x27a   :  { %346 = vsyncpa [#allocation5], 1 }

</bundles_post_ra>
